<compile_context>
chip_gen: v7x
topology: tpu7x:2x2x1
jax: 0.10.0
libtpu: 0.0.40
codegen_flags: <defaults>
</compile_context>

<pallas_src>
import math
import functools

import jax
import jax.numpy as jnp
from jax import lax
from jax.experimental import pallas as pl
from jax.experimental.pallas import tpu as pltpu


def _compute_pe(seq_len: int, d_model: int) -> jnp.ndarray:
    """Reference sinusoidal table (same formula as the PyTorch buffer)."""
    position = jnp.arange(seq_len, dtype=jnp.float32)[:, None]          # (S, 1)
    div_term = jnp.exp(
        jnp.arange(0, d_model, 2, dtype=jnp.float32)
        * (-math.log(10000.0) / d_model)
    )                                                                    # (D/2,)
    ang = position * div_term                                            # (S, D/2)
    pe = jnp.zeros((seq_len, d_model), dtype=jnp.float32)
    pe = pe.at[:, 0::2].set(jnp.sin(ang))
    pe = pe.at[:, 1::2].set(jnp.cos(ang))
    return pe


def _pe_kernel(seed_ref, pos_ref, invf_ref, phase_ref, x_ref, o_ref, *,
               p: float, training: bool):
    # pos_ref:   (tile_s, 1) f32   -- streamed position column
    # invf_ref:  (1, C) f32        -- per-lane inverse frequency (VMEM-resident)
    # phase_ref: (1, C) f32        -- 0 (even ch) or pi/2 (odd ch)
    # x_ref/o_ref: (tile_s, C)
    angle = pos_ref[...] * invf_ref[...] + phase_ref[...]       # (tile_s, C)
    y = x_ref[...].astype(jnp.float32) + jnp.sin(angle)

    if training and p > 0.0:
        if p >= 1.0:
            y = jnp.zeros_like(y)
        else:
            ts, c = y.shape
            # Counter-based hash PRNG (plain VPU integer ops; no pltpu.prng_*,
            # so it also runs under the Pallas interpreter).
            row = lax.broadcasted_iota(jnp.int32, (ts, c), 0).astype(jnp.uint32)
            col = lax.broadcasted_iota(jnp.int32, (ts, c), 1).astype(jnp.uint32)
            base = (pl.program_id(0) * ts).astype(jnp.uint32)
            cnt = (base + row) * jnp.uint32(c) + col             # global counter
            seed_u = seed_ref[0].astype(jnp.uint32)
            h = cnt ^ (seed_u * jnp.uint32(0x9E3779B9))
            h = (h ^ (h >> 16)) * jnp.uint32(0x85EBCA6B)
            h = (h ^ (h >> 13)) * jnp.uint32(0xC2B2AE35)
            h = h ^ (h >> 16)
            threshold = jnp.uint32(min(int(round(p * 2.0 ** 32)), 2 ** 32 - 1))
            keep = h >= threshold                                # P(keep) = 1 - p
            y = jnp.where(keep, y * jnp.float32(1.0 / (1.0 - p)),
                          jnp.float32(0.0))

    o_ref[...] = y.astype(o_ref.dtype)


def _tiling_params():
    """(target_block_bytes, vmem_cap) per TPU generation; safe fallback."""
    try:
        kind = jax.devices()[0].device_kind.lower()
    except Exception:
        kind = ""
    if "v7" in kind:
        return 6 << 20, 48 << 20          # 64 MiB physical VMEM: stay modest
    if ("v5 lite" in kind) or ("v5e" in kind) or ("v6" in kind):
        return 16 << 20, 96 << 20         # 128 MiB VMEM: bigger blocks
    return 8 << 20, 64 << 20              # unknown / CPU interpret: safe middle


class PositionalEncoding:
    """JAX/Pallas port of the PyTorch PositionalEncoding module."""

    def __init__(self, d_model: int, max_len: int = 5000, dropout: float = 0.1):
        self.d_model = int(d_model)
        self.max_len = int(max_len)
        self.p = float(dropout)
        # register_buffer('pe', ...) equivalent, kept for fidelity / testing.
        # The kernel recomputes the identical formula from positions, which
        # also covers forward()'s seq_len > max_len fallback branch.
        self.pe = _compute_pe(self.max_len, self.d_model)

    def __call__(self, x, *, training: bool = False, seed: int = 0):
        # x: [seq_len, batch, d_model]
        seq_len, batch, d_model = x.shape
        assert d_model == self.d_model

        # Fold batch into the lane axis: free row-major reshape; lane width
        # B*D is the widest no-copy fold (unmasked stores whenever B*D % 128 == 0).
        C = batch * d_model
        R = seq_len
        x2 = x.reshape(R, C)

        # Lane-only PE terms, computed once per call (O(C) work in XLA).
        chan = jnp.arange(d_model, dtype=jnp.float32)
        two_k = jnp.floor(chan * 0.5) * 2.0                          # arange(0,D,2) per pair
        inv_freq_d = jnp.exp(two_k * jnp.float32(-math.log(10000.0) / d_model))
        phase_d = jnp.where((jnp.arange(d_model) % 2) == 1,
                            jnp.float32(math.pi / 2.0), jnp.float32(0.0))
        invf = jnp.tile(inv_freq_d, batch).reshape(1, C)
        phase = jnp.tile(phase_d, batch).reshape(1, C)
        pos = jnp.arange(R, dtype=jnp.float32).reshape(R, 1)

        # ---- tiling: dtype-aware sublane rounding, generation-aware block size,
        # and enough grid steps for v7x's two TensorCores. ----
        itemsize = jnp.dtype(x.dtype).itemsize
        sub = {4: 8, 2: 16, 1: 32}.get(itemsize, 8)
        row_bytes = C * itemsize
        target_block_bytes, vmem_cap = _tiling_params()

        if R <= 2 * sub:
            tile_s = R                                 # tiny problem: one block
        else:
            cap_bytes = max(sub, (target_block_bytes // max(row_bytes, 1)) // sub * sub)
            cap_steps = max(sub, (((R + 3) // 4) + sub - 1) // sub * sub)  # aim >= ~4 steps
            tile_s = min(cap_bytes, cap_steps)
            if tile_s >= R:
                tile_s = R
        grid = ((R + tile_s - 1) // tile_s,)

        # VMEM limit from the actual working set: 2x(in+out) double buffers
        # plus the tiny pos/inv_freq/phase blocks and headroom.
        block_bytes = tile_s * row_bytes
        aux_bytes = 2 * (tile_s * 4 + 2 * C * 4) + (64 << 10)
        working = 4 * block_bytes + aux_bytes
        vmem_limit = min(vmem_cap, max(32 << 20, working + (4 << 20)))
        vmem_limit = int(max(vmem_limit, working + (1 << 20)))

        kernel = functools.partial(_pe_kernel, p=self.p, training=bool(training))
        seed_arr = jnp.asarray([seed], dtype=jnp.int32)

        out2 = pl.pallas_call(
            kernel,
            out_shape=jax.ShapeDtypeStruct((R, C), x.dtype),
            grid=grid,
            in_specs=[
                pl.BlockSpec(memory_space=pltpu.MemorySpace.SMEM),    # seed scalar
                pl.BlockSpec((tile_s, 1), lambda i: (i, 0)),          # position column
                pl.BlockSpec((1, C), lambda i: (0, 0)),               # inv_freq (resident)
                pl.BlockSpec((1, C), lambda i: (0, 0)),               # phase    (resident)
                pl.BlockSpec((tile_s, C), lambda i: (i, 0)),          # x
            ],
            out_specs=pl.BlockSpec((tile_s, C), lambda i: (i, 0)),
            compiler_params=pltpu.CompilerParams(
                dimension_semantics=("parallel",),   # no cross-tile carry
                vmem_limit_bytes=vmem_limit),
        )(seed_arr, pos, invf, phase, x2)

        return out2.reshape(seq_len, batch, d_model)


if __name__ == "__main__":
    # Small shapes consistent with forward: x is [seq_len, batch, d_model].
    seq_len, batch, d_model = 8, 2, 32
    max_len = 64

    key = jax.random.PRNGKey(0)
    x = jax.random.normal(key, (seq_len, batch, d_model), dtype=jnp.float32)

    module = PositionalEncoding(d_model=d_model, max_len=max_len, dropout=0.1)

    # Eval-mode forward (dropout is identity, matching module.eval()).
    out = jax.block_until_ready(module(x, training=False))
    ref = x + module.pe[:seq_len][:, None, :]
    assert out.shape == x.shape and out.dtype == x.dtype
    assert jnp.allclose(out, ref, atol=1e-4, rtol=1e-4), (
        "max |diff| = %e" % float(jnp.max(jnp.abs(out - ref))))

    # Multi-tile eval check (exercises grid > 1 and a partial last block).
    seq_len2 = 40
    x2 = jax.random.normal(jax.random.PRNGKey(1), (seq_len2, batch, d_model),
                           dtype=jnp.float32)
    out2 = jax.block_until_ready(module(x2, training=False))
    ref2 = x2 + module.pe[:seq_len2][:, None, :]
    assert jnp.allclose(out2, ref2, atol=1e-4, rtol=1e-4), (
        "max |diff| = %e" % float(jnp.max(jnp.abs(out2 - ref2))))

    # Training-mode path: every element must be either dropped (0) or the
    # reference value scaled by 1/(1-p).
    p = 0.1
    out_tr = jax.block_until_ready(module(x, training=True, seed=123))
    assert out_tr.shape == x.shape and out_tr.dtype == x.dtype
    scaled = ref / (1.0 - p)
    is_dropped = jnp.abs(out_tr) < 1e-6
    is_kept = jnp.abs(out_tr - scaled) < 1e-3
    assert bool(jnp.all(is_dropped | is_kept))

    print("KERNEL_OK")
</pallas_src>

<mosaic_0001>
module attributes {stable_mosaic.version = 11 : i64} {
  func.func @_pe_kernel(%arg0: i32, %arg1: memref<1xi32, #tpu.memory_space<smem>>, %arg2: memref<8x1xf32, #tpu.memory_space<vmem>>, %arg3: memref<1x64xf32, #tpu.memory_space<vmem>>, %arg4: memref<1x64xf32, #tpu.memory_space<vmem>>, %arg5: memref<8x64xf32, #tpu.memory_space<vmem>>, %arg6: memref<8x64xf32, #tpu.memory_space<vmem>>) attributes {dimension_semantics = [#tpu.dimension_semantics<parallel>], iteration_bounds = array<i64: 1>, scalar_prefetch = 0 : i64, scratch_operands = 0 : i64, tpu.core_type = #tpu.core_type<tc>, window_params = [{transform_indices = @transform_0, window_bounds = array<i64: 1>}, {transform_indices = @transform_1, window_bounds = array<i64: 8, 1>}, {pipeline_mode = #tpu.pipeline_mode<synchronous>, transform_indices = @transform_2, window_bounds = array<i64: 1, 64>}, {pipeline_mode = #tpu.pipeline_mode<synchronous>, transform_indices = @transform_3, window_bounds = array<i64: 1, 64>}, {transform_indices = @transform_4, window_bounds = array<i64: 8, 64>}, {transform_indices = @transform_5, window_bounds = array<i64: 8, 64>}]} {
    %c0 = arith.constant 0 : index
    %c0_0 = arith.constant 0 : index
    %0 = vector.load %arg2[%c0, %c0_0] : memref<8x1xf32, #tpu.memory_space<vmem>>, vector<8x1xf32>
    %c0_1 = arith.constant 0 : index
    %c0_2 = arith.constant 0 : index
    %1 = vector.load %arg3[%c0_1, %c0_2] : memref<1x64xf32, #tpu.memory_space<vmem>>, vector<1x64xf32>
    %2 = vector.broadcast %0 : vector<8x1xf32> to vector<8x64xf32>
    %3 = vector.broadcast %1 : vector<1x64xf32> to vector<8x64xf32>
    %4 = arith.mulf %2, %3 : vector<8x64xf32>
    %c0_3 = arith.constant 0 : index
    %c0_4 = arith.constant 0 : index
    %5 = vector.load %arg4[%c0_3, %c0_4] : memref<1x64xf32, #tpu.memory_space<vmem>>, vector<1x64xf32>
    %6 = vector.broadcast %5 : vector<1x64xf32> to vector<8x64xf32>
    %7 = arith.addf %4, %6 : vector<8x64xf32>
    %c0_5 = arith.constant 0 : index
    %c0_6 = arith.constant 0 : index
    %8 = vector.load %arg5[%c0_5, %c0_6] : memref<8x64xf32, #tpu.memory_space<vmem>>, vector<8x64xf32>
    %9 = math.sin %7 : vector<8x64xf32>
    %10 = arith.addf %8, %9 : vector<8x64xf32>
    %c0_7 = arith.constant 0 : index
    %c0_8 = arith.constant 0 : index
    %11 = vector.load %arg6[%c0_7, %c0_8] : memref<8x64xf32, #tpu.memory_space<vmem>>, vector<8x64xf32>
    tpu.vector_store %arg6[%c0_7, %c0_8], %10 {strides = array<i32>} : memref<8x64xf32, #tpu.memory_space<vmem>>, vector<8x64xf32>,
    return
  }
  func.func @transform_0(%arg0: i32) -> i32 {
    %c0_i32 = arith.constant 0 : i32
    %c0_i32_0 = arith.constant 0 : i32
    return %c0_i32 : i32
  }
  func.func @transform_1(%arg0: i32) -> (i32, i32) {
    %c0_i32 = arith.constant 0 : i32
    %c0_i32_0 = arith.constant 0 : i32
    return %arg0, %c0_i32 : i32, i32
  }
  func.func @transform_2(%arg0: i32) -> (i32, i32) {
    %c0_i32 = arith.constant 0 : i32
    %c0_i32_0 = arith.constant 0 : i32
    %c0_i32_1 = arith.constant 0 : i32
    return %c0_i32, %c0_i32_0 : i32, i32
  }
  func.func @transform_3(%arg0: i32) -> (i32, i32) {
    %c0_i32 = arith.constant 0 : i32
    %c0_i32_0 = arith.constant 0 : i32
    %c0_i32_1 = arith.constant 0 : i32
    return %c0_i32, %c0_i32_0 : i32, i32
  }
  func.func @transform_4(%arg0: i32) -> (i32, i32) {
    %c0_i32 = arith.constant 0 : i32
    %c0_i32_0 = arith.constant 0 : i32
    return %arg0, %c0_i32 : i32, i32
  }
  func.func @transform_5(%arg0: i32) -> (i32, i32) {
    %c0_i32 = arith.constant 0 : i32
    %c0_i32_0 = arith.constant 0 : i32
    return %arg0, %c0_i32 : i32, i32
  }
}

</mosaic_0001>

<bundles_post_ra>
// kernel: tpu_custom_call.1
= control target key start
LH: loop header
LB: loop body
LE: loop exit
PB: predicated region body
PF: predicated region fallthrough
CT: control target
= control target key end

     0   :  { %v213_v1 = vmov 0   ;;  %s296_s0 = inlined_call_operand.<no memory space> [shape: s32[1], index: 0, kind: input, shape index: {}]   ;;  %s297_s1 = inlined_call_operand.vmem [shape: f32[8,1], index: 1, kind: input, shape index: {}]   ;;  %s298_s2 = inlined_call_operand.vmem [shape: f32[1,64], index: 2, kind: input, shape index: {}]   ;;  %s299_s3 = inlined_call_operand.vmem [shape: f32[1,64], index: 3, kind: input, shape index: {}]   ;;  %s300_s4 = inlined_call_operand.vmem [shape: f32[8,64], index: 4, kind: input, shape index: {}]   ;;  %s301_s5 = inlined_call_operand.hbm [shape: f32[8,64], index: 5, kind: output, shape index: {}]  }
   0x1   :  { %v22_v0 = vld [vmem:[%s297_s1] sm:$0xff]  ;;  %184 = vset.pattern.permute.xlu0 %v213_v1 }
   0x2   :  { %26 = vperm.xlu0 %184, %v22_v0  }
   0x3   :  { %11 = vsyncpa [#allocation4], 0  ;;  %v166_v2 = vld [vmem:[%s298_s2] ss:$0 sm:$0xff]  ;;  %v214_v17 = vmov 683565275  }
   0x4   :  { %v167_v3 = vld [vmem:[%s299_s3] ss:$0 sm:$0xff]  ;;  %v215_v19 = vmov 2475754826   ;;  %v216_v22 = vmov 2131351028  }
   0x5   :  { %v217_v25 = vmov 2102212464   ;;  %v218_v28 = vmov 920167782   ;;  %v219_v31 = vmov 1326507024  }
   0x6   :  { %s220_s3 = smov [#allocation3]   ;;  %vm150_vm13 = vcmask 523264  }
   0x7   :  { %s158_s23 = sshll.u32 %s220_s3, 4  ;;  %s159_s23 = int_to_ptr.vmem [resolvable:$true] %s158_s23 }
   0x8   :  { %s189_s24 = scalar_lea.vmem %s159_s23, 128  ;;  %p194_p1 = scmp.lt.s32.totalorder %s159_s23, %s159_s23 }
   0x9   :  { %p190_p0 = scmp.ne.s32.totalorder %s159_s23, %s189_s24  ;;  %p195_p2 = scmp.lt.s32.totalorder %s189_s24, %s189_s24 }
   0xb   :  { %p196_p3 = por %p195_p2, %p194_p1 }
   0xd   :  { %p197_p4 = pnand %p196_p3, %p190_p0 }
  0x81   :  { %v27_v4 = vpop.permute.xlu0 %26 }
  0x82   :  { %v35_v5 = vmul.f32 %v166_v2, %v27_v4 }
  0x84   :  { %v260_v6 = vadd.f32 %v167_v3, %v35_v5 }
  0x86   :  { %v48_v7 = vand.u32 2139095040, %v260_v6  ;;  %v45_v11 = vand.u32 2147483647, %v260_v6  ;;  %vm47_vm7 = vcmp.lt.s32.totalorder %v260_v6, 0  ;;  %vm137_vm12 = vweird.f32 %v260_v6 }
  0x88   :  { %v49_v8 = vshrl.u32 %v48_v7, 23  ;;  %v52_v14 = vand.u32 8388607, %v45_v11  ;;  %vm46_vm8 = vcmp.le.f32.partialorder %v45_v11, 0.7853982 }
  0x8a   :  { %v168_v9 = vadd.s32 4294967169, %v49_v8  ;;  %v53_v33 = vor.u32 8388608, %v52_v14 }
  0x8c   :  { %v55_v10 = vadd.s32 1, %v168_v9  ;;  %v93_v47 = vshll.u32 %v53_v33, 8  ;;  %v44_v33 = vld [vmem:[%s300_s4] sm:$0xff] }
  0x8e   :  { %vm56_vm0 = vcmp.gt.s32.totalorder %v55_v10, 0 }
  0x8f   :  { %v57_v12 = vsel %vm56_vm0, %v55_v10, 0 }
  0x90   :  { %v59_v13 = vand.u32 31, %v57_v12  ;;  %v58_v16 = vshrl.u32 %v57_v12, 5 }
  0x92   :  { %v60_v15 = vsub.s32 32, %v59_v13  ;;  %v62_v18 = vshll.u32 %v214_v17, %v59_v13  ;;  %v65_v20 = vshll.u32 %v215_v19, %v59_v13  ;;  %v68_v24 = vshll.u32 %v216_v22, %v59_v13 }
  0x93   :  { %v71_v27 = vshll.u32 %v217_v25, %v59_v13  ;;  %v74_v30 = vshll.u32 %v218_v28, %v59_v13  ;;  %vm77_vm1 = vcmp.lt.s32.totalorder %v58_v16, 1  ;;  %vm80_vm2 = vcmp.lt.s32.totalorder %v58_v16, 4 }
  0x94   :  { %v63_v21 = vshrl.u32 %v215_v19, %v60_v15  ;;  %v66_v23 = vshrl.u32 %v216_v22, %v60_v15  ;;  %v69_v26 = vshrl.u32 %v217_v25, %v60_v15  ;;  %v72_v29 = vshrl.u32 %v218_v28, %v60_v15 }
  0x95   :  { %v75_v32 = vshrl.u32 %v219_v31, %v60_v15  ;;  %v61_v42 = vshrl.u32 %v214_v17, %v60_v15  ;;  %vm79_vm3 = vcmp.lt.s32.totalorder %v58_v16, 3  ;;  %vm78_vm4 = vcmp.lt.s32.totalorder %v58_v16, 2 }
  0x96   :  { %v64_v34 = vor.u32 %v63_v21, %v62_v18  ;;  %v67_v35 = vor.u32 %v66_v23, %v65_v20  ;;  %v70_v36 = vor.u32 %v69_v26, %v68_v24  ;;  %v73_v37 = vor.u32 %v72_v29, %v71_v27 }
  0x97   :  { %v76_v38 = vor.u32 %v75_v32, %v74_v30 }
  0x98   :  { %v82_v39 = vsel %vm80_vm2, %v70_v36, 2102212464  ;;  %v85_v40 = vsel %vm77_vm1, %v64_v34, %v67_v35  ;;  %v89_v41 = vsel %vm77_vm1, %v67_v35, %v70_v36  ;;  %v86_v43 = vsel %vm80_vm2, %v73_v37, 920167782 }
  0x99   :  { %v90_v44 = vsel %vm80_vm2, %v76_v38, 1326507024  ;;  %v87_v45 = vsel %vm79_vm3, %v70_v36, %v86_v43  ;;  %v81_v48 = vsel %vm77_vm1, %v61_v42, %v64_v34  ;;  %v83_v49 = vsel %vm79_vm3, %v67_v35, %v82_v39 }
  0x9a   :  { %v91_v46 = vsel %vm79_vm3, %v73_v37, %v90_v44  ;;  %v88_v50 = vsel %vm78_vm4, %v85_v40, %v87_v45  ;;  %v84_v56 = vsel %vm78_vm4, %v81_v48, %v83_v49 }
  0x9b   :  { %v92_v51 = vsel %vm78_vm4, %v89_v41, %v91_v46  ;;  %v269_v54 = vmul.u32.u64.low %v93_v47, %v88_v50  ;;  %v270_v55 = vmul.u32.u64.high %v93_v47, %v88_v50, %v269_v54  ;;  %v100_v58 = vmul.u32 %v93_v47, %v84_v56 }
  0x9c   :  { %v266_v52 = vmul.u32.u64.low %v93_v47, %v92_v51  ;;  %v267_v53 = vmul.u32.u64.high %v93_v47, %v92_v51, %v266_v52 }
  0x9d   :  { %v103_v57 = vadd.s32 1, %v270_v55 }
  0x9e   :  { %vm102_vm5 = vc.u32 %v267_v53, %v269_v54  ;;  %v101_v7 = vadd.s32 %v269_v54, %v267_v53 }
  0x9f   :  { %v104_v59 = vsel %vm102_vm5, %v103_v57, %v270_v55 }
  0xa0   :  { %v105_v60 = vadd.s32 %v104_v59, %v100_v58 }
  0xa2   :  { %v106_v61 = vadd.s32 536870912, %v105_v60 }
  0xa4   :  { %v107_v62 = vshrl.u32 %v106_v61, 30 }
  0xa6   :  { %v108_v63 = vshll.u32 %v107_v62, 30  ;;  %v131_v20 = vsub.s32 4, %v107_v62 }
  0xa8   :  { %v109_v0 = vsub.s32 %v105_v60, %v108_v63  ;;  %v132_v23 = vsel %vm47_vm7, %v131_v20, %v107_v62 }
  0xa9   :  { %v134_v25 = vsel %vm46_vm8, 0, %v132_v23 }
  0xaa   :  { %v111_v1 = vsub.s32 0, %v109_v0  ;;  %v138_v26 = vadd.s32 3, %v134_v25 }
  0xac   :  { %v169_v2 = vmin.u32 %v111_v1, %v109_v0  ;;  %v139_v27 = vand.u32 3, %v138_v26 }
  0xae   :  { %v113_v3 = vclz %v169_v2  ;;  %vm144_vm9 = vcmp.eq.s32.totalorder %v139_v27, 2  ;;  %vm141_vm10 = vcmp.eq.s32.totalorder %v139_v27, 0  ;;  %vm140_vm11 = vcmp.lt.s32.totalorder %v139_v27, 2 }
  0xb0   :  { %v170_v4 = vadd.s32 4294967294, %v113_v3 }
  0xb2   :  { %vm171_vm6 = vcmp.lt.s32.totalorder %v170_v4, 0 }
  0xb3   :  { %v116_v5 = vsel %vm171_vm6, 0, %v170_v4 }
  0xb4   :  { %v117_v8 = vsub.s32 32, %v116_v5  ;;  %v121_v9 = vsub.s32 4294967266, %v116_v5  ;;  %v118_v10 = vshll.u32 %v109_v0, %v116_v5 }
  0xb6   :  { %v119_v12 = vshrl.u32 %v101_v7, %v117_v8  ;;  %v122_v13 = vadd.s32 127, %v121_v9 }
  0xb8   :  { %v120_v14 = vor.u32 %v119_v12, %v118_v10  ;;  %v123_v15 = vshll.u32 %v122_v13, 23 }
  0xba   :  { %v124_v16 = vor.u32 4788187, %v123_v15  ;;  %v127_v18 = vcvt.s32.f32 %v120_v14 }
  0xbc   :  { %v125_v17 = vand.u32 2147483647, %v124_v16 }
  0xbe   :  { %v128_v19 = vmul.f32 %v127_v18, %v125_v17 }
  0xc0   :  { %v129_v21 = vxor.u32 2147483648, %v128_v19 }
  0xc2   :  { %v130_v22 = vsel %vm47_vm7, %v129_v21, %v128_v19 }
  0xc3   :  { %v133_v24 = vsel %vm46_vm8, %v260_v6, %v130_v22 }
  0xc4   :  { %185 = vcosq.f32 %v133_v24 }
  0xc5   :  { %187 = vsinq.f32 %v133_v24 }
  0xce   :  { %v186_v28 = vpop.eup %185 }
  0xcf   :  { %v188_v29 = vpop.eup %187  ;;  %v145_v30 = vxor.u32 2147483648, %v186_v28 }
  0xd0   :  { %v142_v31 = vxor.u32 2147483648, %v188_v29 }
  0xd1   :  { %v146_v32 = vsel %vm144_vm9, %v145_v30, %v188_v29 }
  0xd2   :  { %v143_v11 = vsel %vm141_vm10, %v186_v28, %v142_v31 }
  0xd3   :  { %v147_v34 = vsel %vm140_vm11, %v143_v11, %v146_v32 }
  0xd4   :  { %v148_v35 = vsel %vm137_vm12, nan, %v147_v34 }
  0xd5   :  { %v149_v36 = vadd.f32 %v148_v35, %v44_v33 }
  0xd7   :  { %151 = vst.msk [vmem:[#allocation3] sm:$0xff] %vm150_vm13, %v149_v36 }
  0xd8   :  { %200 = shalt.err (!%p197_p4)
}
  0xd9   :  { %s201_s26 = scalar_lea.hbm %s301_s5, 128 }
  0xda   :  { %p202_p5 = scmp.ne.s32.totalorder %s301_s5, %s201_s26  ;;  %p205_p6 = scmp.lt.u32.totalorder %s201_s26, %s301_s5 }
  0xdc   :  { %p207_p7 = pnand %p205_p6, %p202_p5 }
  0xde   :  { %210 = shalt.err (!%p207_p7)
}
  0xdf   :  { %161 = dma.vmem_to_hbm [thread:$0]  %s159_s23, 128, %s301_s5, [#allocation4]  }
  0xe0   :  { %211 = dma.done.wait [#allocation4], 128  }
  0xe1   :  { %212 = vsyncadd [#allocation4], 4294967168 }
  0xe2   :  { %165 = vsyncpa [#allocation4], 1 }

</bundles_post_ra>
